<compile_context>
chip_gen: v7x
topology: tpu7x:2x2x1
jax: 0.10.0
libtpu: 0.0.40
codegen_flags: <defaults>
</compile_context>

<pallas_src>
import functools

import jax
import jax.numpy as jnp
from jax.experimental import pallas as pl
from jax.experimental.pallas import tpu as pltpu


def _norm_kernel(scale_smem, bias_smem, img_ref, out_ref, *, num_channels):
    # scale_smem / bias_smem : (C,) float32 SMEM refs (fused per-channel affine)
    # img_ref   / out_ref    : (1, S, 128) VMEM blocks, fully (8,128)-aligned
    c = jax.lax.rem(pl.program_id(0), num_channels)
    s = scale_smem[c]  # scalar read from SMEM; splat via broadcasting (free)
    b = bias_smem[c]
    x = img_ref[...].astype(jnp.float32)
    out_ref[...] = (x * s + b).astype(out_ref.dtype)


def normalization(img, mean, std, *, target_block_bytes=8 * 1024 * 1024):
    """(img - mean[:,None,None]) / std[:,None,None] for NCHW img (Pallas TPU)."""
    N, C, H, W = img.shape
    assert mean.shape == (C,) and std.shape == (C,)
    HW = H * W
    itemsize = img.dtype.itemsize

    # Fold (x - m)/s -> x*(1/s) + (-m/s); keep the affine params in f32.
    scale = (1.0 / std).astype(jnp.float32)
    bias = (-mean / std).astype(jnp.float32)

    # Flatten to (N*C, HW) and make the last axis a clean multiple of 128.
    x = img.reshape(N * C, HW)
    pad = (-HW) % 128
    HW_pad = HW + pad
    if pad:
        # TODO(synk): padding costs one extra HBM pass; only hit when H*W is
        # not a multiple of 128 (rare for real image sizes).
        x = jnp.pad(x, ((0, 0), (0, pad)))
    R = HW_pad // 128
    x = x.reshape(N * C, R, 128)  # lane-dense, (8,128)-tileable layout

    # Sublane rows per block: multiple of 8 (or the full extent), sized so
    # that in+out double-buffered blocks stay well inside scoped VMEM.
    if R * 128 * itemsize <= target_block_bytes:
        S = R  # full-extent block is always legal
    else:
        S = max(8, (target_block_bytes // (128 * itemsize)) // 8 * 8)
    n_tiles = pl.cdiv(R, S)  # tail tile (if any) is masked — correct, cheap

    grid_spec = pltpu.PrefetchScalarGridSpec(
        num_scalar_prefetch=0,
        grid=(N * C, n_tiles),
        in_specs=[
            pl.BlockSpec(memory_space=pltpu.MemorySpace.SMEM),  # scale (C,)
            pl.BlockSpec(memory_space=pltpu.MemorySpace.SMEM),  # bias  (C,)
            pl.BlockSpec((1, S, 128), lambda nc, t: (nc, t, 0)),  # img
        ],
        out_specs=pl.BlockSpec((1, S, 128), lambda nc, t: (nc, t, 0)),
    )

    out = pl.pallas_call(
        functools.partial(_norm_kernel, num_channels=C),
        out_shape=jax.ShapeDtypeStruct((N * C, R, 128), img.dtype),
        grid_spec=grid_spec,
        compiler_params=pltpu.CompilerParams(
            dimension_semantics=("parallel", "parallel"),
            vmem_limit_bytes=48 * 1024 * 1024,
        ),
    )(scale, bias, x)

    out = out.reshape(N * C, HW_pad)
    if pad:
        out = out[:, :HW]
    return out.reshape(N, C, H, W)


if __name__ == "__main__":
    # Deterministic parameters (from the module's __init__)
    mean = jnp.array([0.485, 0.456, 0.406], dtype=jnp.float32)
    std = jnp.array([0.229, 0.224, 0.225], dtype=jnp.float32)

    # Small deterministic input: batch=2, channels=3 (RGB), spatial=16x16, NCHW
    key = jax.random.PRNGKey(0)
    img = jax.random.uniform(key, (2, 3, 16, 16), dtype=jnp.float32)

    out = normalization(img, mean, std)
    out = jax.block_until_ready(out)

    # Reference check against the original semantics (x - m) / s.
    ref = (img - mean[None, :, None, None]) / std[None, :, None, None]
    assert out.shape == ref.shape
    # scale/bias folding changes results by ~1 ULP -> slightly looser tolerance.
    assert jnp.allclose(out, ref, atol=1e-5, rtol=1e-5)

    print("KERNEL_OK")
</pallas_src>

<mosaic_0001>
module attributes {stable_mosaic.version = 11 : i64} {
  func.func @_norm_kernel(%arg0: i32, %arg1: i32, %arg2: memref<3xf32, #tpu.memory_space<smem>>, %arg3: memref<3xf32, #tpu.memory_space<smem>>, %arg4: memref<1x2x128xf32, #tpu.memory_space<vmem>>, %arg5: memref<1x2x128xf32, #tpu.memory_space<vmem>>) attributes {dimension_semantics = [#tpu.dimension_semantics<parallel>, #tpu.dimension_semantics<parallel>], iteration_bounds = array<i64: 6, 1>, scalar_prefetch = 0 : i64, scratch_operands = 0 : i64, tpu.core_type = #tpu.core_type<tc>, window_params = [{transform_indices = @transform_0, window_bounds = array<i64: 3>}, {transform_indices = @transform_1, window_bounds = array<i64: 3>}, {transform_indices = @transform_2, window_bounds = array<i64: 1, 2, 128>}, {transform_indices = @transform_3, window_bounds = array<i64: 1, 2, 128>}]} {
    %c3_i32 = arith.constant 3 : i32
    %0 = arith.remsi %arg0, %c3_i32 : i32
    %1 = arith.index_cast %0 : i32 to index
    %2 = memref.load %arg2[%1] : memref<3xf32, #tpu.memory_space<smem>>
    %3 = arith.index_cast %0 : i32 to index
    %4 = memref.load %arg3[%3] : memref<3xf32, #tpu.memory_space<smem>>
    %c0 = arith.constant 0 : index
    %c0_0 = arith.constant 0 : index
    %c0_1 = arith.constant 0 : index
    %5 = vector.load %arg4[%c0, %c0_0, %c0_1] : memref<1x2x128xf32, #tpu.memory_space<vmem>>, vector<1x2x128xf32>
    %6 = vector.broadcast %2 : f32 to vector<1x2x128xf32>
    %7 = arith.mulf %5, %6 : vector<1x2x128xf32>
    %8 = vector.broadcast %4 : f32 to vector<1x2x128xf32>
    %9 = arith.addf %7, %8 : vector<1x2x128xf32>
    %c0_2 = arith.constant 0 : index
    %c0_3 = arith.constant 0 : index
    %c0_4 = arith.constant 0 : index
    %10 = vector.load %arg5[%c0_2, %c0_3, %c0_4] : memref<1x2x128xf32, #tpu.memory_space<vmem>>, vector<1x2x128xf32>
    tpu.vector_store %arg5[%c0_2, %c0_3, %c0_4], %9 {strides = array<i32>} : memref<1x2x128xf32, #tpu.memory_space<vmem>>, vector<1x2x128xf32>,
    return
  }
  func.func @transform_0(%arg0: i32, %arg1: i32) -> i32 {
    %c0_i32 = arith.constant 0 : i32
    %c0_i32_0 = arith.constant 0 : i32
    return %c0_i32 : i32
  }
  func.func @transform_1(%arg0: i32, %arg1: i32) -> i32 {
    %c0_i32 = arith.constant 0 : i32
    %c0_i32_0 = arith.constant 0 : i32
    return %c0_i32 : i32
  }
  func.func @transform_2(%arg0: i32, %arg1: i32) -> (i32, i32, i32) {
    %c0_i32 = arith.constant 0 : i32
    %c0_i32_0 = arith.constant 0 : i32
    return %arg0, %arg1, %c0_i32 : i32, i32, i32
  }
  func.func @transform_3(%arg0: i32, %arg1: i32) -> (i32, i32, i32) {
    %c0_i32 = arith.constant 0 : i32
    %c0_i32_0 = arith.constant 0 : i32
    return %arg0, %arg1, %c0_i32 : i32, i32, i32
  }
}

</mosaic_0001>

<bundles_post_ra>
// kernel: tpu_custom_call.1
= control target key start
LH: loop header
LB: loop body
LE: loop exit
PB: predicated region body
PF: predicated region fallthrough
CT: control target
= control target key end

     0   :  { %8 = vsyncpa [#allocation5], 0  ;;  %s864_s0 = inlined_call_operand.hbm [shape: f32[3], index: 0, kind: input, shape index: {}]   ;;  %s865_s1 = inlined_call_operand.vmem [shape: f32[3], index: 1, kind: input, shape index: {}]   ;;  %s866_s2 = inlined_call_operand.hbm [shape: f32[6,2,128], index: 2, kind: input, shape index: {}]   ;;  %s867_s3 = inlined_call_operand.hbm [shape: f32[6,2,128], index: 3, kind: output, shape index: {}]  }
   0x1   :  { %9 = vsyncpa [#allocation6], 0 }
   0x2   :  { %10 = vsyncpa [#allocation3], 0 }
   0x3   :  { %12 = vsyncpa [#allocation3 + $0x1], 0 }
   0x4   :  { %13 = vsyncpa [#allocation4], 0 }
   0x5   :  { %15 = vsyncpa [#allocation4 + $0x1], 0  ;;  %s640_s12 = smov 0   ;;  %s642_s13 = smov 0  }
   0x6   :  { %s644_s14 = smov 0   ;;  %s646_s15 = smov 0  }
   0x7   :  { %s648_s16 = smov 0   ;;  %s650_s17 = smov 0  }
   0x8 LB: > { %s362_s18 = sadd.s32 4294967295, %s614_s17   ;;  %s363_s19 = sadd.s32 4294967294, %s614_s17   ;;  %s614_s17 = sphi %s650_s17, %s21_s17   ;;  %s610_s16 = sphi %s648_s16, %s889_s16   ;;  %s606_s15 = sphi %s646_s15, %s888_s15   ;;  %s602_s14 = sphi %s644_s14, %s887_s14   ;;  %s598_s13 = sphi %s642_s13, %s886_s13   ;;  %s594_s12 = sphi %s640_s12, %s885_s12  }
   0x9   : > { %p97_p0 = scmp.ne.s32.totalorder %s598_s13, %s594_s12  ;;  %p674_p1 = scmp.eq.s32.totalorder %s362_s18, 0 }
   0xa   : > { %p678_p2 = scmp.eq.s32.totalorder %s362_s18, 5  ;;  %p129_p3 = scmp.eq.s32.totalorder %s363_s19, 5 }
   0xb   : > { %s872_s20 = scalar_select %p674_p1, 1, 0 }
   0xc   : > { %p684_p4 = por %p674_p1, %p97_p0  ;;  %p364_p5 = scmp.ge.s32.totalorder %s614_s17, 1 }
   0xd   : > { %p689_p6 = por %p129_p3, %p97_p0  ;;  %p136_p7 = scmp.lt.s32.totalorder %s614_s17, 7 }
   0xe   : > { %s874_s22 = scalar_select %p684_p4, 1, 0 }
   0xf   : > { %s875_s23 = scalar_select %p689_p6, 1, 0 }
  0x10   : > { %p694_p8 = pnand %p364_p5, %p136_p7  ;;  %s158_s27 = sshll.u32 %s865_s1, 4  ;;  %s159_s27 = int_to_ptr.vmem [resolvable:$true] %s158_s27 }
  0x11   : > { %s33_s29 = sadd.s32 1, %s610_s16  ;;  %s466_s6 = scalar_lea.hbm %s864_s0, 16 }
  0x12   : > { %s876_s24 = scalar_select %p694_p8, 1, 0 }
  0x13   : > { %p392_p9 = pneg %p694_p8  ;;  %p710_p11 = scmp.ge.s32.totalorder %s33_s29, 6 }
  0x14   : > { %p467_p12 = scmp.ne.s32.totalorder %s864_s0, %s466_s6  ;;  %p473_p5 = scmp.lt.u32.totalorder %s466_s6, %s864_s0 }
  0x15   : > { %p705_p10 = pnand %p392_p9, %p674_p1 }
  0x17   : > { %p468_p13 = pneg %p705_p10 }
  0x19   : > { %p469_p0 = pnand %p468_p13, %p467_p12 }
  0x1b   : > { %p470_p3 = pneg %p469_p0 }
  0x1d   : > { %p475_p7 = pnand %p473_p5, %p470_p3 }
  0x1f   : > { %478 = shalt.err (!%p475_p7)
}
  0x20   : > { %s616_s11 = smov [#allocation2]   ;;  %s479_s25 = scalar_lea.vmem %s159_s27, 16 }
  0x21   : > { %395 = dma.hbm_to_smem (!%p705_p10), %s864_s0, 16, %s616_s11, [#allocation5]  }
  0x22   : > { %p480_p9 = scmp.ne.s32.totalorder %s159_s27, %s479_s25  ;;  %p487_p1 = scmp.lt.s32.totalorder %s159_s27, %s159_s27 }
  0x23   : > { %p488_p12 = scmp.lt.s32.totalorder %s479_s25, %s479_s25 }
  0x24   : > { %p482_p6 = pnand %p480_p9, %p468_p13 }
  0x25   : > { %p489_p0 = por %p488_p12, %p487_p1 }
  0x26   : > { %p483_p4 = pneg %p482_p6 }
  0x28   : > { %p490_p8 = pnand %p489_p0, %p483_p4 }
  0x2a   : > { %493 = shalt.err (!%p490_p8)
}
  0x2b   : > { %s617_s26 = smov [#allocation7]   ;;  %s891_s29 = smov (%p710_p11, %s33_s29), 0 }
  0x2c   : > { %398 = dma.vmem_to_smem (!%p705_p10), %s159_s27, 16, %s617_s26, [#allocation6]  }
  0x2d   : > { %s84_s4 = sadd.s32 1, %s602_s14  ;;  %p91_p1 = scmp.ne.s32.totalorder %s602_s14, %s598_s13 }
  0x2e   : > { %s79_s5 = ssub.s32 %s610_s16, %s891_s29  ;;  %p92_p4 = scmp.eq.s32.totalorder %s614_s17, 0 }
  0x2f   : > { %p82_p6 = scmp.eq.s32.totalorder %s79_s5, 0  ;;  %p744_p8 = por %p678_p2, %p91_p1 }
  0x30   : > { %p93_p13 = por %p92_p4, %p91_p1  ;;  %p409_p3 = scmp.lt.s32.totalorder %s614_s17, 6 }
  0x31   : > { %s750_s6 = scalar_select %p82_p6, %s602_s14, %s84_s4  }
  0x32   : > { %s169_s7 = sand.u32 1, %s602_s14   ;;  %s369_s27 = sshll.u32 %s610_s16, 5 }
  0x33   : > { %s368_s30 = sshll.u32 %s169_s7, 1  ;;  %s757_s10 = scalar_lea.hbm %s866_s2, %s369_s27 }
  0x34   : > { %s173_s21 = scalar_lea.vmem [#allocation8], %s368_s30  ;;  %p759_p2 = pnand %p409_p3, %p93_p13 }
  0x35   : > { %s181_s11 = sshll.u32 %s173_s21, 4  ;;  %s170_s19 = scalar_lea.sflag [#allocation3], %s169_s7  ;;  %s763_s11 = int_to_ptr.vmem [resolvable:$true] %s181_s11 }
  0x36   : > { %s494_s25 = scalar_lea.hbm %s757_s10, 32  ;;  %p496_p11 = pneg %p759_p2 }
  0x37   : > { %p495_p10 = scmp.ne.s32.totalorder %s757_s10, %s494_s25  ;;  %s499_s5 = scalar_lea.hbm %s866_s2, 192 }
  0x38   : > { %p500_p9 = scmp.lt.u32.totalorder %s757_s10, %s866_s2  ;;  %p501_p12 = scmp.lt.u32.totalorder %s499_s5, %s494_s25 }
  0x39   : > { %p497_p5 = pnand %p496_p11, %p495_p10  ;;  %p503_p1 = scmp.lt.u32.totalorder %s494_s25, %s757_s10 }
  0x3a   : > { %p502_p0 = por %p501_p12, %p500_p9 }
  0x3b   : > { %p498_p7 = pneg %p497_p5 }
  0x3c   : > { %p504_p4 = por %p503_p1, %p502_p0 }
  0x3e   : > { %p505_p6 = pnand %p504_p4, %p498_p7 }
  0x40   : > { %508 = shalt.err (!%p505_p6)
}
  0x41   : > { %s509_s7 = scalar_lea.vmem %s763_s11, 32  ;;  %s618_s8 = smov [#allocation8]  }
  0x42   : > { %p510_p13 = scmp.ne.s32.totalorder %s763_s11, %s509_s7  ;;  %s514_s9 = sshll.u32 %s618_s8, 4  ;;  %s515_s9 = int_to_ptr.vmem [resolvable:$false] %s514_s9 }
  0x43   : > { %s516_s21 = scalar_lea.vmem %s515_s9, 64  ;;  %p517_p5 = scmp.lt.s32.totalorder %s763_s11, %s515_s9 }
  0x44   : > { %p512_p3 = pnand %p510_p13, %p496_p11  ;;  %p518_p9 = scmp.lt.s32.totalorder %s516_s21, %s509_s7 }
  0x46   : > { %p513_p10 = pneg %p512_p3  ;;  %p519_p12 = por %p518_p9, %p517_p5 }
  0x48   : > { %p520_p0 = pnand %p519_p12, %p513_p10 }
  0x4a   : > { %523 = shalt.err (!%p520_p0)
}
  0x4b   : > { %402 = dma.hbm_to_vmem [thread:$0]  (!%p759_p2), %s757_s10, 32, %s763_s11, %s170_s19  }
  0x4c   : > { %p881_p7 = scmp.ne.s32.totalorder %s876_s24, 0 }
  0x4d   : > { %p882_p11 = scmp.ne.s32.totalorder (!%p881_p7), %s872_s20, 0 }
  0x4e   : > { %190 = sbr.rel (%p881_p7) target bundleno = 133 (0x85), region = 32 }
  0x55   : > { %577 = dma.done.wait (%p882_p11), [#allocation5], 16  }
  0x56   : > { %579 = vsyncadd (%p882_p11), [#allocation5], 4294967280 }
  0x57   : > { %581 = dma.done.wait (%p882_p11), [#allocation6], 16  }
  0x58   : > { %583 = vsyncadd (%p882_p11), [#allocation6], 4294967280  ;;  %s801_s18 = sand.u32 1, %s598_s13   ;;  %p883_p2 = scmp.ne.s32.totalorder %s874_s22, 0 }
  0x59   : > { %s373_s24 = sshll.u32 %s801_s18, 1  ;;  %s201_s10 = scalar_lea.sflag [#allocation3], %s801_s18 }
  0x5a   : > { %s204_s11 = scalar_lea.vmem [#allocation8], %s373_s24 }
  0x5b   : > { %585 = dma.done.wait (%p883_p2), %s201_s10, 32  }
  0x5c   : > { %587 = vsyncadd (%p883_p2), %s201_s10, 4294967264 }
  0x5d   : > { %209 = sfence }
  0x5e   : > { %s229_s20 = ssub.s32 0, %s606_s15  ;;  %p228_p1 = scmp.lt.s32.totalorder %s606_s15, 0  ;;  %v237_v0 = vld [vmem:[%s204_s11] sm:$0x3] }
  0x5f   : > { %s375_s19 = smin.u32 %s606_s15, %s229_s20  ;;  %s227_s27 = scalar_lea.vmem [#allocation9], %s373_s24 }
  0x60   : > { %464 = sdivrem.u32 %s375_s19, 3  ;;  %s258_s22 = sshll.u32 %s227_s27, 4  ;;  %s813_s22 = int_to_ptr.vmem [resolvable:$true] %s258_s22 }
  0x61   : > { %s377_s30 = sshll.u32 %s606_s15, 5  ;;  %s244_s21 = scalar_lea.sflag [#allocation4], %s801_s18 }
  0x62   : > { %s818_s9 = scalar_lea.hbm %s867_s3, %s377_s30  ;;  %s524_s10 = scalar_lea.vmem %s813_s22, 32 }
  0x63   : > { %p525_p4 = scmp.ne.s32.totalorder %s813_s22, %s524_s10  ;;  %s619_s15 = smov [#allocation9]  }
  0x64   : > { %s528_s24 = sshll.u32 %s619_s15, 4  ;;  %s529_s24 = int_to_ptr.vmem [resolvable:$false] %s528_s24 }
  0x65   : > { %p526_p6 = pnand %p525_p4, %p744_p8  ;;  %s530_s11 = scalar_lea.vmem %s529_s24, 64 }
  0x66   : > { %p531_p3 = scmp.lt.s32.totalorder %s813_s22, %s529_s24  ;;  %p532_p10 = scmp.lt.s32.totalorder %s530_s11, %s524_s10 }
  0x67   : > { %p527_p13 = pneg %p526_p6 }
  0x68   : > { %p533_p5 = por %p532_p10, %p531_p3 }
  0x69   : > { %s465_s25 = spop.drf %464 }
  0x6a   : > { %s233_s26 = ssub.s32 0, %s465_s25  ;;  %p534_p9 = pnand %p533_p5, %p527_p13 }
  0x6b   : > { %s893_s26 = smov (!%p228_p1, %s233_s26), %s465_s25 }
  0x6c   : > { %s235_s4 = sld [smem:[#allocation2 + %s893_s26]] }
  0x6d   : > { %s236_s5 = sld [smem:[#allocation7 + %s893_s26]] }
  0x72   : > { %v238_v1 = vstv %s235_s4 }
  0x73   : > { %v239_v2 = vmul.f32 %v238_v1, %v237_v0  ;;  %v240_v3 = vstv %s236_s5 }
  0x75   : > { %v241_v4 = vadd.f32 %v240_v3, %v239_v2 }
  0x77   : > { %242 = vst [vmem:[%s227_s27] sm:$0x3] %v241_v4 }
  0x78   : > { %537 = shalt.err (!%p534_p9)
}
  0x79   : > { %s538_s18 = scalar_lea.hbm %s818_s9, 32  ;;  %s542_s25 = scalar_lea.hbm %s867_s3, 192 }
  0x7a   : > { %p539_p12 = scmp.ne.s32.totalorder %s818_s9, %s538_s18  ;;  %p543_p11 = scmp.lt.u32.totalorder %s818_s9, %s867_s3 }
  0x7b   : > { %p544_p2 = scmp.lt.u32.totalorder %s542_s25, %s538_s18  ;;  %p546_p4 = scmp.lt.u32.totalorder %s538_s18, %s818_s9 }
  0x7c   : > { %p540_p0 = pnand %p539_p12, %p744_p8 }
  0x7d   : > { %p545_p1 = por %p544_p2, %p543_p11 }
  0x7e   : > { %p541_p7 = pneg %p540_p0 }
  0x7f   : > { %p547_p6 = por %p546_p4, %p545_p1 }
  0x81   : > { %p548_p13 = pnand %p547_p6, %p541_p7 }
  0x83   : > { %551 = shalt.err (!%p548_p13)
}
  0x84   : > { %390 = dma.vmem_to_hbm [thread:$0]  (%p744_p8), %s813_s22, 32, %s818_s9, %s244_s21  }
  0x85 PF: > { %p412_p3 = scmp.ge.s32.totalorder %s614_s17, 2  ;;  %s270_s5 = sand.u32 1, %s594_s12  }
  0x86   : > { %p884_p10 = scmp.ne.s32.totalorder %s875_s23, 0  ;;  %s271_s27 = scalar_lea.sflag [#allocation4], %s270_s5 }
  0x88   : > { %p404_p5 = pnand %p412_p3, %p884_p10 }
  0x8a   : > { %589 = dma.done.wait (!%p404_p5), %s271_s27, 32  }
  0x8b   : > { %591 = vsyncadd (!%p404_p5), %s271_s27, 4294967264  ;;  %s21_s17 = sadd.s32 1, %s614_s17   ;;  %s885_s12 = smov %s598_s13 }
  0x8c   : > { %p18_p9 = scmp.ge.s32.totalorder %s21_s17, 8   ;;  %s886_s13 = smov %s602_s14 }
  0x8d   : > { %s887_s14 = smov %s750_s6  ;;  %s888_s15 = smov %s610_s16 }
  0x8e   : > { %s889_s16 = smov %s891_s29  ;;  %20 = sbr.rel (!%p18_p9) target bundleno = 8 (0x8), region = 87 }
  0x95   :  { %276 = vsyncpa [#allocation3], 1 }
  0x96   :  { %278 = vsyncpa [#allocation3 + $0x1], 1 }
  0x97   :  { %279 = vsyncpa [#allocation4], 1 }
  0x98   :  { %281 = vsyncpa [#allocation4 + $0x1], 1 }
  0x99   :  { %282 = vsyncpa [#allocation5], 1 }
  0x9a   :  { %284 = vsyncpa [#allocation5 + $0x1], 1 }
  0x9b   :  { %285 = vsyncpa [#allocation6], 1 }
  0x9c   :  { %287 = vsyncpa [#allocation6 + $0x1], 1 }

</bundles_post_ra>
